<compile_context>
chip_gen: v6e
topology: v6e:2x2x1
jax: 0.10.0
libtpu: 0.0.40
codegen_flags: <defaults>
</compile_context>

<pallas_src>
import functools

import jax
import jax.numpy as jnp
from jax.experimental import pallas as pl
from jax.experimental.pallas import tpu as pltpu


def _round_up(x, m):
    return ((x + m - 1) // m) * m


def classifier_kernel(scale1_ref, scale2_ref, x_ref, v1_ref, b1_ref,
                      v2_ref, b2_ref, out_ref):
    """One batch tile: out = (relu(x @ v1 * s1 + b1) * s2) @ v2 + b2."""
    s1 = scale1_ref[0, 0]            # SMEM scalar: g1 / ||V1||_F
    s2 = scale2_ref[0, 0]            # SMEM scalar: g2 / ||V2||_F

    x = x_ref[...]                                       # (tile_b, in_dim) bf16
    h = jnp.dot(x, v1_ref[...], preferred_element_type=jnp.float32)
    h = h * s1 + b1_ref[...]                             # f32 epilogue
    h = jnp.maximum(h, 0.0)                              # ReLU
    # Dropout(p, inplace=True): identity in eval mode.
    # TODO(synk): training-mode dropout (pltpu.prng_seed/prng_random_bits) not implemented.

    # Fold s2 into h (width hid_pad <= out_pad) before the second matmul.
    h2 = (h * s2).astype(v2_ref.dtype)
    out = jnp.dot(h2, v2_ref[...], preferred_element_type=jnp.float32) + b2_ref[...]
    out_ref[...] = out[:, :out_ref.shape[-1]].astype(out_ref.dtype)


def simple_classifier(x, v1, g1, b1, v2, g2, b2, *, tile_b=512,
                      compute_dtype=jnp.bfloat16, lane_dense_out=True):
    """x: (B, in_dim). v1: (in_dim, hid), v2: (hid, out). g*: scalar-like. b*: (1, dim)."""
    B, in_dim = x.shape
    hid_dim = v1.shape[1]
    out_dim = v2.shape[1]

    # weight_norm(dim=None): W = g * V / ||V||_F (Frobenius). Weight-only ->
    # precompute the scalar scale once (f32) and fold into the epilogue.
    scale1 = (jnp.reshape(g1, ()) * jax.lax.rsqrt(jnp.sum(v1 * v1))
              ).reshape(1, 1).astype(jnp.float32)
    scale2 = (jnp.reshape(g2, ()) * jax.lax.rsqrt(jnp.sum(v2 * v2))
              ).reshape(1, 1).astype(jnp.float32)

    # Lane-dense padding: hid -> multiple of 128 (zeros exact through ReLU and
    # zero v2 rows); out -> multiple of 128 for the matmul N dim.
    hid_pad = _round_up(hid_dim, 128)
    out_pad = _round_up(out_dim, 128)
    # lane_dense_out=True  -> unmasked vst, but out_pad/out_dim write amplification.
    # lane_dense_out=False -> masked vst of only out_dim columns (fewer HBM bytes).
    out_store = out_pad if lane_dense_out else out_dim

    v1p = jnp.pad(v1, ((0, 0), (0, hid_pad - hid_dim))).astype(compute_dtype)
    b1p = jnp.pad(b1, ((0, 0), (0, hid_pad - hid_dim))).astype(jnp.float32)
    v2p = jnp.pad(v2, ((0, hid_pad - hid_dim),
                       (0, out_pad - out_dim))).astype(compute_dtype)
    b2p = jnp.pad(b2, ((0, 0), (0, out_pad - out_dim))).astype(jnp.float32)

    # Batch tile: big (256-512) to amortize the ~0.35 us/step grid overhead,
    # but clamped so the grid stays >= 2 (v7x: both TensorCores get work).
    tile_b = max(8, min(int(tile_b), 512))
    if B > 8:
        tile_b = min(tile_b, _round_up(pl.cdiv(B, 2), 8))
    else:
        tile_b = 8
    b_pad = _round_up(B, tile_b)
    xp = x.astype(compute_dtype)
    if b_pad != B:
        xp = jnp.pad(xp, ((0, b_pad - B), (0, 0)))
    grid = (b_pad // tile_b,)

    cbytes = jnp.dtype(compute_dtype).itemsize
    flops = 2 * b_pad * (in_dim * hid_pad + hid_pad * out_pad)
    bytes_accessed = (cbytes * (b_pad * in_dim + in_dim * hid_pad + hid_pad * out_pad)
                      + 4 * (hid_pad + out_pad + b_pad * out_store))

    # VMEM budget: double-buffered x/out tiles + single-buffered weights/biases.
    vmem_needed = (2 * tile_b * in_dim * cbytes
                   + 2 * tile_b * out_store * 4
                   + in_dim * hid_pad * cbytes + hid_pad * out_pad * cbytes
                   + hid_pad * 4 + out_pad * 4)
    vmem_limit = min(max(2 * int(vmem_needed) + (2 << 20), 8 << 20), 48 << 20)

    smem_scalar = pl.BlockSpec((1, 1), lambda i: (0, 0),
                               memory_space=pltpu.MemorySpace.SMEM)
    # Resident operands: constant index_map -> single pipeline buffer suffices.
    resident = functools.partial(pl.BlockSpec, pipeline_mode=pl.Buffered(1))

    out = pl.pallas_call(
        classifier_kernel,
        out_shape=jax.ShapeDtypeStruct((b_pad, out_store), jnp.float32),
        grid=grid,
        in_specs=[
            smem_scalar,                                          # scale1 (SMEM)
            smem_scalar,                                          # scale2 (SMEM)
            pl.BlockSpec((tile_b, in_dim), lambda i: (i, 0)),     # x (batch-tiled)
            resident((in_dim, hid_pad), lambda i: (0, 0)),        # v1 (resident)
            resident((1, hid_pad), lambda i: (0, 0)),             # b1 (resident)
            resident((hid_pad, out_pad), lambda i: (0, 0)),       # v2 (resident)
            resident((1, out_pad), lambda i: (0, 0)),             # b2 (resident)
        ],
        out_specs=pl.BlockSpec((tile_b, out_store), lambda i: (i, 0)),
        compiler_params=pltpu.CompilerParams(
            dimension_semantics=("parallel",),
            vmem_limit_bytes=vmem_limit),
        cost_estimate=pl.CostEstimate(flops=flops, transcendentals=0,
                                      bytes_accessed=bytes_accessed),
    )(scale1, scale2, xp, v1p, b1p, v2p, b2p)

    return out[:B, :out_dim]


def reference(x, v1, g1, b1, v2, g2, b2):
    w1 = v1 * (jnp.reshape(g1, ()) / jnp.sqrt(jnp.sum(v1 * v1)))
    w2 = v2 * (jnp.reshape(g2, ()) / jnp.sqrt(jnp.sum(v2 * v2)))
    h = jnp.maximum(x @ w1 + b1, 0.0)
    return h @ w2 + b2


if __name__ == "__main__":
    # Small shapes consistent with the module: Linear(in_dim, hid) -> Linear(hid, out)
    B, in_dim, hid_dim, out_dim = 16, 32, 64, 16

    key = jax.random.PRNGKey(0)
    k_x, k_v1, k_b1, k_v2, k_b2 = jax.random.split(key, 5)

    x = jax.random.normal(k_x, (B, in_dim), dtype=jnp.float32)

    # PyTorch stores Linear weight as (out, in); we keep the (in, out) transposed
    # layout. The Frobenius norm is transpose-invariant, so weight_norm(dim=None)
    # semantics are unchanged.
    v1 = jax.random.normal(k_v1, (in_dim, hid_dim), dtype=jnp.float32) * 0.1
    b1 = jax.random.normal(k_b1, (1, hid_dim), dtype=jnp.float32) * 0.1
    v2 = jax.random.normal(k_v2, (hid_dim, out_dim), dtype=jnp.float32) * 0.1
    b2 = jax.random.normal(k_b2, (1, out_dim), dtype=jnp.float32) * 0.1
    # weight_norm init sets g = ||v||; perturb slightly so the scaling is exercised.
    g1 = (jnp.sqrt(jnp.sum(v1 * v1)) * 1.1).reshape(1, 1)
    g2 = (jnp.sqrt(jnp.sum(v2 * v2)) * 0.9).reshape(1, 1)

    logits = jax.block_until_ready(simple_classifier(x, v1, g1, b1, v2, g2, b2))

    ref = reference(x, v1, g1, b1, v2, g2, b2)
    assert logits.shape == (B, out_dim)
    # bf16 matmul inputs (f32 accumulation) -> relaxed tolerance vs f32 reference.
    err = float(jnp.max(jnp.abs(logits - ref)))
    assert jnp.allclose(logits, ref, atol=2e-2, rtol=2e-2), f"mismatch vs reference (max abs err {err})"

    print("KERNEL_OK")
</pallas_src>

<mosaic_0001>
module attributes {stable_mosaic.version = 11 : i64} {
  func.func @classifier_kernel(%arg0: i32, %arg1: memref<1x1xf32, #tpu.memory_space<smem>>, %arg2: memref<1x1xf32, #tpu.memory_space<smem>>, %arg3: memref<8x32xbf16, #tpu.memory_space<vmem>>, %arg4: memref<32x128xbf16, #tpu.memory_space<vmem>>, %arg5: memref<1x128xf32, #tpu.memory_space<vmem>>, %arg6: memref<128x128xbf16, #tpu.memory_space<vmem>>, %arg7: memref<1x128xf32, #tpu.memory_space<vmem>>, %arg8: memref<8x128xf32, #tpu.memory_space<vmem>>) attributes {dimension_semantics = [#tpu.dimension_semantics<parallel>], iteration_bounds = array<i64: 2>, scalar_prefetch = 0 : i64, scratch_operands = 0 : i64, tpu.core_type = #tpu.core_type<tc>, window_params = [{transform_indices = @transform_0, window_bounds = array<i64: 1, 1>}, {transform_indices = @transform_1, window_bounds = array<i64: 1, 1>}, {transform_indices = @transform_2, window_bounds = array<i64: 8, 32>}, {pipeline_mode = #tpu.pipeline_mode<synchronous>, transform_indices = @transform_3, window_bounds = array<i64: 32, 128>}, {pipeline_mode = #tpu.pipeline_mode<synchronous>, transform_indices = @transform_4, window_bounds = array<i64: 1, 128>}, {pipeline_mode = #tpu.pipeline_mode<synchronous>, transform_indices = @transform_5, window_bounds = array<i64: 128, 128>}, {pipeline_mode = #tpu.pipeline_mode<synchronous>, transform_indices = @transform_6, window_bounds = array<i64: 1, 128>}, {transform_indices = @transform_7, window_bounds = array<i64: 8, 128>}]} {
    %c0 = arith.constant 0 : index
    %c0_0 = arith.constant 0 : index
    %0 = memref.load %arg1[%c0, %c0_0] : memref<1x1xf32, #tpu.memory_space<smem>>
    %c0_1 = arith.constant 0 : index
    %c0_2 = arith.constant 0 : index
    %1 = memref.load %arg2[%c0_1, %c0_2] : memref<1x1xf32, #tpu.memory_space<smem>>
    %c0_3 = arith.constant 0 : index
    %c0_4 = arith.constant 0 : index
    %2 = vector.load %arg3[%c0_3, %c0_4] : memref<8x32xbf16, #tpu.memory_space<vmem>>, vector<8x32xbf16>
    %c0_5 = arith.constant 0 : index
    %c0_6 = arith.constant 0 : index
    %3 = vector.load %arg4[%c0_5, %c0_6] : memref<32x128xbf16, #tpu.memory_space<vmem>>, vector<32x128xbf16>
    %cst = arith.constant dense<0.000000e+00> : vector<8x128xf32>
    %4 = tpu.matmul %2, %3, %cst {dimension_numbers = #tpu.dot_dimension_numbers<[1], [0], [0], [1], [0, 0, 1, 1], [], []>} : vector<8x32xbf16>, vector<32x128xbf16>, vector<8x128xf32> -> vector<8x128xf32>
    %5 = vector.broadcast %0 : f32 to vector<8x128xf32>
    %6 = arith.mulf %4, %5 : vector<8x128xf32>
    %c0_7 = arith.constant 0 : index
    %c0_8 = arith.constant 0 : index
    %7 = vector.load %arg5[%c0_7, %c0_8] : memref<1x128xf32, #tpu.memory_space<vmem>>, vector<1x128xf32>
    %8 = vector.broadcast %7 : vector<1x128xf32> to vector<8x128xf32>
    %9 = arith.addf %6, %8 : vector<8x128xf32>
    %cst_9 = arith.constant 0.000000e+00 : f32
    %10 = vector.broadcast %cst_9 : f32 to vector<8x128xf32>
    %11 = arith.maximumf %9, %10 : vector<8x128xf32>
    %12 = vector.broadcast %1 : f32 to vector<8x128xf32>
    %13 = arith.mulf %11, %12 : vector<8x128xf32>
    %14 = arith.truncf %13 : vector<8x128xf32> to vector<8x128xbf16>
    %c0_10 = arith.constant 0 : index
    %c0_11 = arith.constant 0 : index
    %15 = vector.load %arg6[%c0_10, %c0_11] : memref<128x128xbf16, #tpu.memory_space<vmem>>, vector<128x128xbf16>
    %cst_12 = arith.constant dense<0.000000e+00> : vector<8x128xf32>
    %16 = tpu.matmul %14, %15, %cst_12 {dimension_numbers = #tpu.dot_dimension_numbers<[1], [0], [0], [1], [0, 0, 1, 1], [], []>} : vector<8x128xbf16>, vector<128x128xbf16>, vector<8x128xf32> -> vector<8x128xf32>
    %c0_13 = arith.constant 0 : index
    %c0_14 = arith.constant 0 : index
    %17 = vector.load %arg7[%c0_13, %c0_14] : memref<1x128xf32, #tpu.memory_space<vmem>>, vector<1x128xf32>
    %18 = vector.broadcast %17 : vector<1x128xf32> to vector<8x128xf32>
    %19 = arith.addf %16, %18 : vector<8x128xf32>
    %c0_15 = arith.constant 0 : index
    %c0_16 = arith.constant 0 : index
    %20 = vector.load %arg8[%c0_15, %c0_16] : memref<8x128xf32, #tpu.memory_space<vmem>>, vector<8x128xf32>
    tpu.vector_store %arg8[%c0_15, %c0_16], %19 {strides = array<i32>} : memref<8x128xf32, #tpu.memory_space<vmem>>, vector<8x128xf32>,
    return
  }
  func.func @transform_0(%arg0: i32) -> (i32, i32) {
    %c0_i32 = arith.constant 0 : i32
    %c0_i32_0 = arith.constant 0 : i32
    %c0_i32_1 = arith.constant 0 : i32
    return %c0_i32, %c0_i32_0 : i32, i32
  }
  func.func @transform_1(%arg0: i32) -> (i32, i32) {
    %c0_i32 = arith.constant 0 : i32
    %c0_i32_0 = arith.constant 0 : i32
    %c0_i32_1 = arith.constant 0 : i32
    return %c0_i32, %c0_i32_0 : i32, i32
  }
  func.func @transform_2(%arg0: i32) -> (i32, i32) {
    %c0_i32 = arith.constant 0 : i32
    %c0_i32_0 = arith.constant 0 : i32
    return %arg0, %c0_i32 : i32, i32
  }
  func.func @transform_3(%arg0: i32) -> (i32, i32) {
    %c0_i32 = arith.constant 0 : i32
    %c0_i32_0 = arith.constant 0 : i32
    %c0_i32_1 = arith.constant 0 : i32
    return %c0_i32, %c0_i32_0 : i32, i32
  }
  func.func @transform_4(%arg0: i32) -> (i32, i32) {
    %c0_i32 = arith.constant 0 : i32
    %c0_i32_0 = arith.constant 0 : i32
    %c0_i32_1 = arith.constant 0 : i32
    return %c0_i32, %c0_i32_0 : i32, i32
  }
  func.func @transform_5(%arg0: i32) -> (i32, i32) {
    %c0_i32 = arith.constant 0 : i32
    %c0_i32_0 = arith.constant 0 : i32
    %c0_i32_1 = arith.constant 0 : i32
    return %c0_i32, %c0_i32_0 : i32, i32
  }
  func.func @transform_6(%arg0: i32) -> (i32, i32) {
    %c0_i32 = arith.constant 0 : i32
    %c0_i32_0 = arith.constant 0 : i32
    %c0_i32_1 = arith.constant 0 : i32
    return %c0_i32, %c0_i32_0 : i32, i32
  }
  func.func @transform_7(%arg0: i32) -> (i32, i32) {
    %c0_i32 = arith.constant 0 : i32
    %c0_i32_0 = arith.constant 0 : i32
    return %arg0, %c0_i32 : i32, i32
  }
}

</mosaic_0001>

<bundles_post_ra>
// kernel: tpu_custom_call.1
= control target key start
LH: loop header
LB: loop body
LE: loop exit
PB: predicated region body
PF: predicated region fallthrough
CT: control target
= control target key end

     0   :  { %s1156_s0 = inlined_call_operand.<no memory space> [shape: f32[1,1], index: 0, kind: input, shape index: {}]   ;;  %s1157_s1 = inlined_call_operand.<no memory space> [shape: f32[1,1], index: 1, kind: input, shape index: {}]   ;;  %s1158_s2 = inlined_call_operand.hbm [shape: bf16[16,32], index: 2, kind: input, shape index: {}]   ;;  %s1159_s3 = inlined_call_operand.hbm [shape: bf16[32,128], index: 3, kind: input, shape index: {}]   ;;  %s1160_s4 = inlined_call_operand.vmem [shape: f32[1,128], index: 4, kind: input, shape index: {}]   ;;  %s1161_s5 = inlined_call_operand.hbm [shape: bf16[128,128], index: 5, kind: input, shape index: {}]   ;;  %s1162_s6 = inlined_call_operand.vmem [shape: f32[1,128], index: 6, kind: input, shape index: {}]   ;;  %s1163_s7 = inlined_call_operand.hbm [shape: f32[16,128], index: 7, kind: output, shape index: {}]  }
   0x1   :  { %12 = sst [smem:[#allocation2]] %s1156_s0 }
   0x2   :  { %13 = sst [smem:[#allocation3]] %s1157_s1 }
   0x3   :  { %14 = vsyncpa [#allocation5], 0 }
   0x4   :  { %16 = vsyncpa [#allocation5 + $0x1], 0 }
   0x5   :  { %17 = vsyncpa [#allocation8], 0 }
   0x6   :  { %18 = vsyncpa [#allocation6], 0 }
   0x7   :  { %20 = vsyncpa [#allocation6 + $0x1], 0  ;;  %s972_s28 = smov 0   ;;  %s974_s29 = smov 0  }
   0x8   :  { %s976_s30 = smov 0   ;;  %s978_s8 = smov 0  }
   0x9 LB: > { %s993_s0 = sadd.s32 4294967295, %s916_s8   ;;  %s618_s1 = sadd.s32 4294967294, %s916_s8   ;;  %s916_s8 = sphi %s978_s8, %s1185_s8   ;;  %s912_s30 = sphi %s976_s30, %s1184_s30   ;;  %s908_s29 = sphi %s974_s29, %s1183_s29   ;;  %s904_s28 = sphi %s972_s28, %s1182_s28  }
   0xa   : > { %p88_p0 = scmp.ne.s32.totalorder %s908_s29, %s904_s28  ;;  %p1164_p1 = scmp.eq.s32.totalorder %s993_s0, 0 }
   0xb   : > { %p202_p3 = scmp.eq.s32.totalorder %s618_s1, 1  ;;  %p619_p5 = scmp.ge.s32.totalorder %s916_s8, 1 }
   0xc   : > { %p1002_p4 = por %p1164_p1, %p88_p0  ;;  %p209_p7 = scmp.lt.s32.totalorder %s916_s8, 3 }
   0xd   : > { %p1007_p6 = por %p202_p3, %p88_p0  ;;  %s918_s12 = smov [#allocation7]  }
   0xe   : > { %s1168_s9 = scalar_select %p1002_p4, 1, 0 }
   0xf   : > { %s1169_s10 = scalar_select %p1007_p6, 1, 0 }
  0x10   : > { %p1012_p8 = pnand %p619_p5, %p209_p7  ;;  %s227_s13 = sshll.u32 %s918_s12, 4  ;;  %s228_s13 = int_to_ptr.vmem [resolvable:$true] %s227_s13 }
  0x11   : > { %s919_s15 = smov [#allocation9]   ;;  %s779_s17 = scalar_lea.vmem %s228_s13, 256 }
  0x12   : > { %s1170_s11 = scalar_select %p1012_p8, 1, 0 }
  0x13   : > { %p699_p9 = pneg %p1012_p8  ;;  %s243_s16 = sshll.u32 %s919_s15, 4  ;;  %s244_s16 = int_to_ptr.vmem [resolvable:$true] %s243_s16 }
  0x14   : > { %p780_p13 = scmp.ne.s32.totalorder %s228_s13, %s779_s17  ;;  %p787_p5 = scmp.lt.s32.totalorder %s228_s13, %s228_s13 }
  0x15   : > { %p1021_p11 = pnand %p699_p9, %p1164_p1  ;;  %p788_p7 = scmp.lt.s32.totalorder %s779_s17, %s779_s17 }
  0x17   : > { %p770_p12 = pneg %p1021_p11  ;;  %p789_p10 = por %p788_p7, %p787_p5 }
  0x19   : > { %p782_p0 = pnand %p780_p13, %p770_p12 }
  0x1b   : > { %p783_p3 = pneg %p782_p0 }
  0x1d   : > { %p790_p9 = pnand %p789_p10, %p783_p3 }
  0x1f   : > { %793 = shalt.err (!%p790_p9)
}
  0x20   : > { %s920_s18 = smov 64   ;;  %s921_s19 = smov 4  }
  0x21   : > { %702 = dma.hbm_to_vmem [thread:$0]  (!%p1021_p11), %s1159_s3, 256, %s228_s13, [#allocation8], %s920_s18, %s920_s18, %s921_s19  }
  0x22   : > { %s805_s22 = scalar_lea.vmem %s244_s16, 1024  ;;  %p813_p2 = scmp.lt.s32.totalorder %s244_s16, %s244_s16 }
  0x23   : > { %p806_p1 = scmp.ne.s32.totalorder %s244_s16, %s805_s22  ;;  %p814_p6 = scmp.lt.s32.totalorder %s805_s22, %s805_s22 }
  0x25   : > { %p808_p13 = pnand %p806_p1, %p770_p12  ;;  %p815_p5 = por %p814_p6, %p813_p2 }
  0x27   : > { %p809_p0 = pneg %p808_p13 }
  0x29   : > { %p816_p10 = pnand %p815_p5, %p809_p0 }
  0x2b   : > { %819 = shalt.err (!%p816_p10)
}
  0x2c   : > { %705 = dma.hbm_to_vmem [thread:$0]  (!%p1021_p11), %s1161_s5, 1024, %s244_s16, [#allocation8], %s920_s18, %s920_s18, %s921_s19  }
  0x2d   : > { %s1044_s25 = sadd.s32 1, %s916_s8   ;;  %s75_s26 = sadd.s32 1, %s912_s30 }
  0x2e   : > { %s72_s27 = ssub.s32 %s916_s8, %s1044_s25  ;;  %p82_p1 = scmp.ne.s32.totalorder %s912_s30, %s908_s29 }
  0x2f   : > { %p73_p2 = scmp.eq.s32.totalorder %s72_s27, 0  ;;  %p83_p6 = scmp.eq.s32.totalorder %s916_s8, 0 }
  0x30   : > { %p1172_p12 = scmp.eq.s32.totalorder %s993_s0, 1  ;;  %p716_p7 = scmp.lt.s32.totalorder %s916_s8, 2 }
  0x31   : > { %s1060_s12 = scalar_select %p73_p2, %s912_s30, %s75_s26  }
  0x32   : > { %p1054_p3 = por %p1172_p12, %p82_p1  ;;  %p84_p9 = por %p83_p6, %p82_p1 }
  0x33   : > { %s260_s13 = sand.u32 1, %s912_s30   ;;  %s624_s15 = sshll.u32 %s916_s8, 6 }
  0x34   : > { %s1173_s1 = scalar_select %p1054_p3, 1, 0 }
  0x35   : > { %s623_s14 = sshll.u32 %s260_s13, 2  ;;  %s1067_s18 = scalar_lea.hbm %s1158_s2, %s624_s15 }
  0x36   : > { %s264_s19 = scalar_lea.vmem [#allocation4], %s623_s14  ;;  %p1069_p11 = pnand %p716_p7, %p84_p9 }
  0x37   : > { %s271_s20 = sshll.u32 %s264_s19, 4  ;;  %s261_s22 = scalar_lea.sflag [#allocation5], %s260_s13  ;;  %s272_s20 = int_to_ptr.vmem [resolvable:$true] %s271_s20 }
  0x38   : > { %s820_s23 = scalar_lea.hbm %s1067_s18, 64  ;;  %p822_p0 = pneg %p1069_p11 }
  0x39   : > { %p821_p13 = scmp.ne.s32.totalorder %s1067_s18, %s820_s23  ;;  %s825_s27 = scalar_lea.hbm %s1158_s2, 128 }
  0x3a   : > { %p826_p1 = scmp.lt.s32.totalorder %s1067_s18, %s1158_s2  ;;  %p827_p2 = scmp.lt.s32.totalorder %s825_s27, %s820_s23 }
  0x3b   : > { %p823_p5 = pnand %p822_p0, %p821_p13 }
  0x3c   : > { %p828_p6 = por %p827_p2, %p826_p1 }
  0x3d   : > { %p824_p10 = pneg %p823_p5 }
  0x3f   : > { %p829_p12 = pnand %p828_p6, %p824_p10 }
  0x41   : > { %832 = shalt.err (!%p829_p12)
}
  0x42   : > { %s833_s16 = scalar_lea.vmem %s272_s20, 64  ;;  %s922_s13 = smov [#allocation4]  }
  0x43   : > { %p834_p7 = scmp.ne.s32.totalorder %s272_s20, %s833_s16  ;;  %s838_s17 = sshll.u32 %s922_s13, 4  ;;  %s839_s17 = int_to_ptr.vmem [resolvable:$false] %s838_s17 }
  0x44   : > { %s840_s19 = scalar_lea.vmem %s839_s17, 128  ;;  %p841_p13 = scmp.lt.s32.totalorder %s272_s20, %s839_s17 }
  0x45   : > { %p836_p9 = pnand %p834_p7, %p822_p0  ;;  %p842_p5 = scmp.lt.s32.totalorder %s840_s19, %s833_s16 }
  0x47   : > { %p837_p3 = pneg %p836_p9  ;;  %p843_p4 = por %p842_p5, %p841_p13 }
  0x49   : > { %p844_p8 = pnand %p843_p4, %p837_p3 }
  0x4b   : > { %847 = shalt.err (!%p844_p8)
}
  0x4c   : > { %709 = dma.hbm_to_vmem [thread:$0]  (!%p1069_p11), %s1067_s18, 64, %s272_s20, %s261_s22  }
  0x4d   : > { %p1175_p10 = scmp.ne.s32.totalorder %s1170_s11, 0 }
  0x4e   : > { %s1090_s23 = sand.u32 (!%p1175_p10), 1, %s908_s29   ;;  %p1176_p0 = scmp.ne.s32.totalorder (!%p1175_p10), %s1168_s9, 0 }
  0x4f   : > { %280 = sbr.rel (%p1175_p10) target bundleno = 510 (0x1fe), region = 48  ;;  %s626_s24 = sshll.u32 (!%p1175_p10), %s1090_s23, 2 }
  0x50   : > { %s283_s26 = scalar_lea.sflag (!%p1175_p10), [#allocation5], %s1090_s23  ;;  %s286_s27 = scalar_lea.vmem (!%p1175_p10), [#allocation4], %s626_s24 }
  0x54   : > { %891 = dma.done.wait (%p1176_p0), %s283_s26, 64  }
  0x55   : > { %893 = vsyncadd (%p1176_p0), %s283_s26, 4294967232  ;;  %p1177_p4 = scmp.eq.s32.totalorder %s993_s0, 0 }
  0x57   : > { %895 = dma.done.wait (%p1177_p4), [#allocation8], 1280   ;;  %p1178_p8 = pmov %p1177_p4 }
  0x58   : > { %v923_v0 = vmov 0.0   ;;  %vm924_vm0 = vmmov 0   ;;  %v758_v1 = vld [vmem:[#allocation7 + $0x8] sm:$0xff]   ;;  %v759_v2 = vld [vmem:[#allocation7] sm:$0xff]   ;;  %vm345_vm1 = vcmask 261120   ;;  %v762_v6 = vld [vmem:[#allocation9 + $0x28] sm:$0xff]  }
  0x59   : > { %897 = vsyncadd (%p1178_p8), [#allocation8], 4294966016  ;;  %659 = vmatprep.subr.bf16.mxu0 %v923_v0  ;;  %663 = vmatprep.mubr.msk.bf16.mxu0 %vm924_vm0, %v923_v0  ;;  %v760_v3 = vld [vmem:[#allocation9 + $0x38] sm:$0xff]   ;;  %v761_v4 = vld [vmem:[#allocation9 + $0x30] sm:$0xff]   ;;  %s326_s9 = sld [smem:[#allocation2]]  ;;  %s629_s21 = sshll.u32 %s1090_s23, 3 }
  0x5a   : > { %667 = vmatprep.subr.bf16.mxu1 %v923_v0  ;;  %683 = vmatprep.mubr.msk.bf16.mxu1 %vm924_vm0, %v923_v0  ;;  %v328_v5 = vld [vmem:[%s286_s27] sm:$0xf]  ;;  %v763_v7 = vld [vmem:[#allocation9 + $0x20] sm:$0xff]   ;;  %v764_v8 = vld [vmem:[#allocation9 + $0x18] sm:$0xff]   ;;  %s327_s11 = sld [smem:[#allocation3]]  ;;  %s644_s14 = sshll.u32 %s993_s0, 7 }
  0x5b   : > { %660 = vmatpush3.bf16.msra.mxu0 %v758_v1  ;;  %668 = vmatpush3.bf16.msra.mxu1 %v760_v3  ;;  %v765_v9 = vld [vmem:[#allocation9 + $0x10] sm:$0xff]   ;;  %v766_v10 = vld [vmem:[#allocation9 + $0x8] sm:$0xff]   ;;  %v767_v11 = vld [vmem:[#allocation9] sm:$0xff]   ;;  %s324_s16 = scalar_lea.vmem [#allocation10], %s629_s21  ;;  %s1113_s24 = scalar_lea.hbm %s1163_s7, %s644_s14 }
  0x5c   : > { %661 = vmatprep.subr.bf16.mxu0 %v923_v0  ;;  %669 = vmatprep.subr.bf16.mxu1 %v923_v0  ;;  %v633_v14 = vld [vmem:[%s1160_s4] ss:$0 sm:$0xff]  ;;  %s529_s13 = sshll.u32 %s324_s16, 4  ;;  %s516_s26 = scalar_lea.sflag [#allocation6], %s1090_s23  ;;  %s1115_s13 = int_to_ptr.vmem [resolvable:$true] %s529_s13 }
  0x5d   : > { %v634_v24 = vld [vmem:[%s1162_s6] ss:$0 sm:$0xff]  ;;  %s848_s27 = scalar_lea.vmem %s1115_s13, 128  ;;  %p1179_p11 = scmp.ne.s32.totalorder %s1173_s1, 0 }
  0x5e   : > { %p849_p3 = scmp.ne.s32.totalorder %s1115_s13, %s848_s27  ;;  %s925_s0 = smov [#allocation10]  }
  0x5f   : > { %662 = vmatpush3.bf16.msra.mxu0 %v759_v2  ;;  %670 = vmatpush3.bf16.msra.mxu1 %v761_v4  ;;  %v389_v12 = vstv %s326_s9  ;;  %s852_s9 = sshll.u32 %s925_s0, 4  ;;  %s853_s9 = int_to_ptr.vmem [resolvable:$false] %s852_s9 }
  0x60   : > { %671 = vmatprep.subr.bf16.mxu1 %v923_v0  ;;  %v400_v19 = vstv %s327_s11  ;;  %p850_p1 = pnand %p849_p3, %p1179_p11  ;;  %s854_s11 = scalar_lea.vmem %s853_s9, 256 }
  0x61   : > { %p855_p6 = scmp.lt.s32.totalorder %s1115_s13, %s853_s9  ;;  %p856_p12 = scmp.lt.s32.totalorder %s854_s11, %s848_s27 }
  0x62   : > { %664 = vmatmul.mubr.msk.bf16.vlgmr.msra.gmra.mxu0 %vm345_vm1, %v328_v5  ;;  %p851_p2 = pneg %p850_p1 }
  0x63   : > { %672 = vmatpush3.bf16.msra.mxu1 %v762_v6  ;;  %p857_p7 = por %p856_p12, %p855_p6 }
  0x64   : > { %673 = vmatprep.subr.bf16.mxu1 %v923_v0 }
  0x65   : > { %p858_p9 = pnand %p857_p7, %p851_p2 }
  0x67   : > { %674 = vmatpush3.bf16.msra.mxu1 %v763_v7 }
  0x68   : > { %675 = vmatprep.subr.bf16.mxu1 %v923_v0 }
  0x6b   : > { %676 = vmatpush3.bf16.msra.mxu1 %v764_v8 }
  0x6c   : > { %677 = vmatprep.subr.bf16.mxu1 %v923_v0 }
  0x6f   : > { %678 = vmatpush3.bf16.msra.mxu1 %v765_v9 }
  0x70   : > { %679 = vmatprep.subr.bf16.mxu1 %v923_v0 }
  0x73   : > { %680 = vmatpush3.bf16.msra.mxu1 %v766_v10 }
  0x74   : > { %681 = vmatprep.subr.bf16.mxu1 %v923_v0 }
  0x77   : > { %682 = vmatpush3.bf16.msra.mxu1 %v767_v11 }
 0x122   : > { %v383_v13 = vpop.f32.mrf.mxu0 }
 0x123   : > { %v390_v15 = vmul.f32 %v389_v12, %v383_v13 }
 0x124   : > { %v665_v16 = vpop.f32.mrf.mxu0 }
 0x125   : > { %v398_v17 = vadd.f32 %v633_v14, %v390_v15 }
 0x126   : > { %v386_v18 = vpop.f32.mrf.mxu0 }
 0x127   : > { %v399_v20 = vmax.f32 %v398_v17, 0.0 }
 0x128   : > { %v666_v21 = vpop.f32.mrf.mxu0 }
 0x129   : > { %v401_v22 = vmul.f32 %v400_v19, %v399_v20 }
 0x12b   : > { %v402_v23 = vpack.c.bf16 %v401_v22, %v401_v22 }
 0x12d   : > { %684 = vmatmul.mubr.bf16.vlgmr.msra.gmra.mxu1 %v402_v23 }
 0x1ed   : > { %v508_v25 = vpop.f32.mrf.mxu1 }
 0x1ee   : > { %v509_v26 = vadd.f32 %v634_v24, %v508_v25 }
 0x1ef   : > { %v685_v27 = vpop.f32.mrf.mxu1 }
 0x1f0   : > { %514 = vst [vmem:[%s324_s16] sm:$0xff] %v509_v26 }
 0x1f1   : > { %v511_v28 = vpop.f32.mrf.mxu1 }
 0x1f2   : > { %861 = shalt.err (!%p858_p9)
}
 0x1f3   : > { %s862_s18 = scalar_lea.hbm %s1113_s24, 128  ;;  %s866_s21 = scalar_lea.hbm %s1163_s7, 256 }
 0x1f4   : > { %p863_p13 = scmp.ne.s32.totalorder %s1113_s24, %s862_s18  ;;  %p867_p0 = scmp.lt.s32.totalorder %s1113_s24, %s1163_s7 }
 0x1f5   : > { %p868_p4 = scmp.lt.s32.totalorder %s866_s21, %s862_s18 }
 0x1f6   : > { %p864_p5 = pnand %p863_p13, %p1179_p11 }
 0x1f7   : > { %p869_p8 = por %p868_p4, %p867_p0 }
 0x1f8   : > { %p865_p10 = pneg %p864_p5 }
 0x1fa   : > { %p870_p3 = pnand %p869_p8, %p865_p10 }
 0x1fc   : > { %873 = shalt.err (!%p870_p3)
}
 0x1fd   : > { %697 = dma.vmem_to_hbm [thread:$0]  (%p1179_p11), %s1115_s13, 128, %s1113_s24, %s516_s26   ;;  %v686_v29 = vpop.f32.mrf.mxu1 }
 0x1fe PF: > { %s541_s14 = sand.u32 1, %s904_s28   ;;  %p1180_p1 = scmp.ne.s32.totalorder %s1169_s10, 0 }
 0x1ff   : > { %p1181_p2 = scmp.ge.s32.totalorder %s916_s8, 2  ;;  %s542_s16 = scalar_lea.sflag [#allocation6], %s541_s14 }
 0x201   : > { %p711_p6 = pnand %p1181_p2, %p1180_p1 }
 0x203   : > { %p712_p12 = pneg %p711_p6 }
 0x205   : > { %899 = dma.done.wait (%p712_p12), %s542_s16, 128  }
 0x206   : > { %901 = vsyncadd (%p712_p12), %s542_s16, 4294967168  ;;  %p23_p7 = scmp.ge.s32.totalorder %s1044_s25, 4   ;;  %s1182_s28 = smov %s908_s29 }
 0x207   : > { %s1183_s29 = smov %s912_s30  ;;  %s1184_s30 = smov %s1060_s12 }
 0x208   : > { %s1185_s8 = smov %s1044_s25  ;;  %25 = sbr.rel (!%p23_p7) target bundleno = 9 (0x9), region = 101 }
 0x20d   :  { %547 = vsyncpa [#allocation5], 1 }
 0x20e   :  { %549 = vsyncpa [#allocation5 + $0x1], 1 }
 0x20f   :  { %550 = vsyncpa [#allocation8], 1 }
 0x210   :  { %551 = vsyncpa [#allocation6], 1 }
 0x211   :  { %553 = vsyncpa [#allocation6 + $0x1], 1 }

</bundles_post_ra>
